<compile_context>
chip_gen: v7x
topology: tpu7x:2x2x1
jax: 0.10.0
libtpu: 0.0.40
codegen_flags: <defaults>
</compile_context>

<pallas_src>
import math

import jax
import jax.numpy as jnp
from jax.experimental import pallas as pl
from jax.experimental.pallas import tpu as pltpu


# ----------------------------------------------------------------------------
# Kernel: one MXU push + bias add per lane-dense row tile.
# ----------------------------------------------------------------------------
def _encoder_kernel(h_ref, w_ref, b_ref, out_ref):
    # h_ref:   (tm_r, in_r)    packed input rows (in_r multiple of 128 lanes)
    # w_ref:   (in_r, out_r)   block-diagonal fused proj_h->to_out weight
    # b_ref:   (1, out_r)      tiled fused bias
    # out_ref: (tm_r, out_r)   lane-dense output tile (out_r multiple of 128)
    y = jnp.dot(h_ref[...], w_ref[...], preferred_element_type=jnp.float32)
    out_ref[...] = (y + b_ref[...]).astype(out_ref.dtype)


# ----------------------------------------------------------------------------
# Weight prep (hoist: call once per weight update, reuse across forwards).
# ----------------------------------------------------------------------------
def _lcm(a, b):
    return a * b // math.gcd(a, b)


def choose_pack(in_dim, hidden_dec, dtype_bytes=4, max_weight_bytes=8 << 20):
    """Smallest row-packing factor making pack*in_dim AND pack*hidden_dec
    multiples of 128 lanes (dense DMA / vld / vst / MXU contraction)."""
    p_in = 128 // math.gcd(in_dim, 128)
    p_out = 128 // math.gcd(hidden_dec, 128)
    pack = _lcm(p_in, p_out)
    # Safety valve for odd configs: keep the block-diagonal weight small.
    while pack > 1 and (pack * in_dim) * (pack * hidden_dec) * dtype_bytes > max_weight_bytes:
        pack //= 2
    return max(pack, 1)


def fuse_and_pack_weights(w_proj, b_proj, w_out, pack):
    """Fuse proj_h (in->enc, bias) and to_out (enc->dec, no bias) into one
    affine map (exact: nothing between them), then build the block-diagonal
    packed weight/bias the kernel consumes.

    w_proj: (hidden_enc, in_dim)    proj_h.weight (PyTorch layout)
    b_proj: (hidden_enc,)           proj_h.bias
    w_out : (hidden_dec, hidden_enc) to_out.weight
    """
    w_fused = jnp.dot(w_proj.T, w_out.T)                 # (in_dim, hidden_dec)
    b_fused = jnp.dot(b_proj, w_out.T)                   # (hidden_dec,)
    eye = jnp.eye(pack, dtype=w_fused.dtype)
    w_pack = jnp.kron(eye, w_fused)                      # (pack*in_dim, pack*hd)
    b_pack = jnp.tile(b_fused, pack)[None, :]            # (1, pack*hd)
    return w_pack, b_pack


# ----------------------------------------------------------------------------
# Forward (Pallas path, pre-packed weights).
# ----------------------------------------------------------------------------
def darcy_encoder_forward(h, w_pack, b_pack, *, in_dim, hidden_dec, pack,
                          tm_packed=2048, out_dtype=None,
                          vmem_tile_budget_bytes=24 << 20):
    """h: [B, N, in_dim] -> [B, N, hidden_dec] using pre-packed fused weights."""
    B, N, d = h.shape
    assert d == in_dim
    out_dtype = h.dtype if out_dtype is None else jnp.dtype(out_dtype)
    M = B * N
    in_r = pack * in_dim
    out_r = pack * hidden_dec

    in_bytes = jnp.dtype(h.dtype).itemsize
    out_bytes = jnp.dtype(out_dtype).itemsize

    # ---- row-tile selection -------------------------------------------------
    M_r_min = -(-M // pack)                               # packed rows (ceil)
    tm_r = min(tm_packed, ((M_r_min + 7) // 8) * 8)
    if M_r_min >= 64:
        # keep >= 4 grid steps so the "parallel" axis actually feeds both v7x TCs
        tm_r = min(tm_r, max(8, (M_r_min // 4) // 8 * 8))
    # cap the double-buffered in+out tile footprint well inside scoped VMEM
    per_row_bytes = 2 * (in_r * in_bytes + out_r * out_bytes)
    tm_r = min(tm_r, max(8, (vmem_tile_budget_bytes // per_row_bytes) // 8 * 8))
    tm_r = max(8, (tm_r // 8) * 8)

    n_tiles = -(-M_r_min // tm_r)
    M_r = n_tiles * tm_r
    M_pad = M_r * pack

    # ---- pad + pack the input rows (row-major views; at most one pad copy) --
    h_flat = h.reshape(M, in_dim)
    if M_pad != M:
        h_flat = jnp.pad(h_flat, ((0, M_pad - M), (0, 0)))
    h_r = h_flat.reshape(M_r, in_r)

    w_bytes = w_pack.size * w_pack.dtype.itemsize
    b_bytes = b_pack.size * b_pack.dtype.itemsize
    cost = pl.CostEstimate(
        flops=2 * M_r * in_r * out_r,                     # real MXU work incl. block-diag zeros
        transcendentals=0,
        bytes_accessed=(M_r * in_r * in_bytes + M_r * out_r * out_bytes
                        + n_tiles * (w_bytes + b_bytes)),
    )

    out_packed = pl.pallas_call(
        _encoder_kernel,
        out_shape=jax.ShapeDtypeStruct((M_r, out_r), out_dtype),
        grid_spec=pltpu.PrefetchScalarGridSpec(
            num_scalar_prefetch=0,
            grid=(n_tiles,),
            in_specs=[
                pl.BlockSpec((tm_r, in_r), lambda i: (i, 0)),
                pl.BlockSpec((in_r, out_r), lambda i: (0, 0)),
                pl.BlockSpec((1, out_r), lambda i: (0, 0)),
            ],
            out_specs=pl.BlockSpec((tm_r, out_r), lambda i: (i, 0)),
        ),
        compiler_params=pltpu.CompilerParams(
            dimension_semantics=("parallel",),            # shard row tiles across v7x TCs
            vmem_limit_bytes=32 * 1024 * 1024,            # > v5e default 16 MiB, fits v7x 64 MiB
        ),
        cost_estimate=cost,
    )(h_r, w_pack, b_pack)

    out = out_packed.reshape(M_pad, hidden_dec)           # pure row-major view
    if M_pad != M:
        out = out[:M]
    return out.reshape(B, N, hidden_dec)


# ----------------------------------------------------------------------------
# Convenience wrapper (per-call weight prep; falls back to XLA for tiny B*N).
# ----------------------------------------------------------------------------
def darcy_flow_encoder(h, w_proj, b_proj, w_out, *, min_pallas_rows=512, **kwargs):
    B, N, in_dim = h.shape
    hidden_dec = w_out.shape[0]
    M = B * N
    if M < min_pallas_rows:
        # Launch + prep overhead dominates at tiny sizes; plain XLA wins.
        w_fused = jnp.dot(w_proj.T, w_out.T)
        b_fused = jnp.dot(b_proj, w_out.T)
        return (h.reshape(M, in_dim) @ w_fused + b_fused).reshape(B, N, hidden_dec)
    pack = choose_pack(in_dim, hidden_dec, jnp.dtype(h.dtype).itemsize)
    w_pack, b_pack = fuse_and_pack_weights(w_proj, b_proj, w_out, pack)
    return darcy_encoder_forward(h, w_pack, b_pack, in_dim=in_dim,
                                 hidden_dec=hidden_dec, pack=pack, **kwargs)


def reference(h, w_proj, b_proj, w_out):
    z = jnp.einsum("bni,oi->bno", h, w_proj) + b_proj
    return jnp.einsum("bno,do->bnd", z, w_out)


if __name__ == "__main__":
    # net_params consistent with the module's forward (eval mode, num_layers=1).
    in_dim, hidden_dim_enc, hidden_dim_dec = 4, 32, 32
    B, N = 2, 2048        # 2 samples x a small Darcy point cloud (64x32 grid)

    key = jax.random.PRNGKey(0)
    k_h, k_w1, k_b1, k_w2 = jax.random.split(key, 4)

    h = jax.random.normal(k_h, (B, N, in_dim), dtype=jnp.float32)

    # PyTorch-style Linear init: U(-1/sqrt(fan_in), 1/sqrt(fan_in)), deterministic.
    bnd1 = 1.0 / (in_dim ** 0.5)
    w_proj = jax.random.uniform(k_w1, (hidden_dim_enc, in_dim),
                                minval=-bnd1, maxval=bnd1, dtype=jnp.float32)
    b_proj = jax.random.uniform(k_b1, (hidden_dim_enc,),
                                minval=-bnd1, maxval=bnd1, dtype=jnp.float32)
    bnd2 = 1.0 / (hidden_dim_enc ** 0.5)
    w_out = jax.random.uniform(k_w2, (hidden_dim_dec, hidden_dim_enc),
                               minval=-bnd2, maxval=bnd2, dtype=jnp.float32)

    # Hoisted weight prep: done once per weight update, not per forward call.
    pack = choose_pack(in_dim, hidden_dim_dec)
    w_pack, b_pack = fuse_and_pack_weights(w_proj, b_proj, w_out, pack)
    w_pack, b_pack = jax.block_until_ready((w_pack, b_pack))

    out = darcy_encoder_forward(h, w_pack, b_pack, in_dim=in_dim,
                                hidden_dec=hidden_dim_dec, pack=pack)
    out = jax.block_until_ready(out)

    ref = reference(h, w_proj, b_proj, w_out)
    assert out.shape == (B, N, hidden_dim_dec)
    max_err = float(jnp.max(jnp.abs(out - ref)))
    assert jnp.allclose(out, ref, atol=1e-5, rtol=1e-5), max_err

    print("KERNEL_OK")
</pallas_src>

<mosaic_0001>
module attributes {stable_mosaic.version = 11 : i64} {
  func.func @_encoder_kernel(%arg0: i32, %arg1: memref<32x128xf32, #tpu.memory_space<vmem>>, %arg2: memref<128x1024xf32, #tpu.memory_space<vmem>>, %arg3: memref<1x1024xf32, #tpu.memory_space<vmem>>, %arg4: memref<32x1024xf32, #tpu.memory_space<vmem>>) attributes {dimension_semantics = [#tpu.dimension_semantics<parallel>], iteration_bounds = array<i64: 4>, scalar_prefetch = 0 : i64, scratch_operands = 0 : i64, tpu.core_type = #tpu.core_type<tc>, window_params = [{transform_indices = @transform_0, window_bounds = array<i64: 32, 128>}, {pipeline_mode = #tpu.pipeline_mode<synchronous>, transform_indices = @transform_1, window_bounds = array<i64: 128, 1024>}, {pipeline_mode = #tpu.pipeline_mode<synchronous>, transform_indices = @transform_2, window_bounds = array<i64: 1, 1024>}, {transform_indices = @transform_3, window_bounds = array<i64: 32, 1024>}]} {
    %c0 = arith.constant 0 : index
    %c0_0 = arith.constant 0 : index
    %0 = vector.load %arg1[%c0, %c0_0] : memref<32x128xf32, #tpu.memory_space<vmem>>, vector<32x128xf32>
    %c0_1 = arith.constant 0 : index
    %c0_2 = arith.constant 0 : index
    %1 = vector.load %arg2[%c0_1, %c0_2] : memref<128x1024xf32, #tpu.memory_space<vmem>>, vector<128x1024xf32>
    %cst = arith.constant dense<0.000000e+00> : vector<32x1024xf32>
    %2 = tpu.matmul %0, %1, %cst {dimension_numbers = #tpu.dot_dimension_numbers<[1], [0], [0], [1], [0, 0, 1, 1], [], []>} : vector<32x128xf32>, vector<128x1024xf32>, vector<32x1024xf32> -> vector<32x1024xf32>
    %c0_3 = arith.constant 0 : index
    %c0_4 = arith.constant 0 : index
    %3 = vector.load %arg3[%c0_3, %c0_4] : memref<1x1024xf32, #tpu.memory_space<vmem>>, vector<1x1024xf32>
    %4 = vector.broadcast %3 : vector<1x1024xf32> to vector<32x1024xf32>
    %5 = arith.addf %2, %4 : vector<32x1024xf32>
    %c0_5 = arith.constant 0 : index
    %c0_6 = arith.constant 0 : index
    %6 = vector.load %arg4[%c0_5, %c0_6] : memref<32x1024xf32, #tpu.memory_space<vmem>>, vector<32x1024xf32>
    tpu.vector_store %arg4[%c0_5, %c0_6], %5 {strides = array<i32>} : memref<32x1024xf32, #tpu.memory_space<vmem>>, vector<32x1024xf32>,
    return
  }
  func.func @transform_0(%arg0: i32) -> (i32, i32) {
    %c0_i32 = arith.constant 0 : i32
    %c0_i32_0 = arith.constant 0 : i32
    return %arg0, %c0_i32 : i32, i32
  }
  func.func @transform_1(%arg0: i32) -> (i32, i32) {
    %c0_i32 = arith.constant 0 : i32
    %c0_i32_0 = arith.constant 0 : i32
    %c0_i32_1 = arith.constant 0 : i32
    return %c0_i32, %c0_i32_0 : i32, i32
  }
  func.func @transform_2(%arg0: i32) -> (i32, i32) {
    %c0_i32 = arith.constant 0 : i32
    %c0_i32_0 = arith.constant 0 : i32
    %c0_i32_1 = arith.constant 0 : i32
    return %c0_i32, %c0_i32_0 : i32, i32
  }
  func.func @transform_3(%arg0: i32) -> (i32, i32) {
    %c0_i32 = arith.constant 0 : i32
    %c0_i32_0 = arith.constant 0 : i32
    return %arg0, %c0_i32 : i32, i32
  }
}

</mosaic_0001>

<bundles_post_ra>
// kernel: tpu_custom_call.1
= control target key start
LH: loop header
LB: loop body
LE: loop exit
PB: predicated region body
PF: predicated region fallthrough
CT: control target
= control target key end

     0   :  { %8 = vsyncpa [#allocation3], 0  ;;  %s1627_s0 = inlined_call_operand.hbm [shape: f32[128,128], index: 0, kind: input, shape index: {}]   ;;  %s1628_s1 = inlined_call_operand.hbm [shape: f32[128,1024], index: 1, kind: input, shape index: {}]   ;;  %s1629_s2 = inlined_call_operand.hbm [shape: f32[1,1024], index: 2, kind: input, shape index: {}]   ;;  %s1630_s3 = inlined_call_operand.hbm [shape: f32[128,1024], index: 3, kind: output, shape index: {}]  }
   0x1   :  { %10 = vsyncpa [#allocation3 + $0x1], 0 }
   0x2   :  { %11 = vsyncpa [#allocation6], 0 }
   0x3   :  { %12 = vsyncpa [#allocation4], 0 }
   0x4   :  { %14 = vsyncpa [#allocation4 + $0x1], 0  ;;  %s1300_s12 = smov 0   ;;  %s1302_s13 = smov 0  }
   0x5   :  { %s1304_s14 = smov 0   ;;  %s1306_s15 = smov 0  }
   0x6 LB: > { %s1321_s16 = sadd.s32 4294967295, %s1267_s15   ;;  %s887_s17 = sadd.s32 4294967294, %s1267_s15   ;;  %s1267_s15 = sphi %s1306_s15, %s1649_s15   ;;  %s1263_s14 = sphi %s1304_s14, %s1648_s14   ;;  %s1259_s13 = sphi %s1302_s13, %s1647_s13   ;;  %s1255_s12 = sphi %s1300_s12, %s1646_s12  }
   0x7   : > { %p40_p0 = scmp.ne.s32.totalorder %s1259_s13, %s1255_s12  ;;  %p1631_p1 = scmp.eq.s32.totalorder %s1321_s16, 0 }
   0x8   : > { %p112_p3 = scmp.eq.s32.totalorder %s887_s17, 3  ;;  %p888_p5 = scmp.ge.s32.totalorder %s1267_s15, 1 }
   0x9   : > { %p1330_p4 = por %p1631_p1, %p40_p0  ;;  %p119_p7 = scmp.lt.s32.totalorder %s1267_s15, 5 }
   0xa   : > { %p1335_p6 = por %p112_p3, %p40_p0  ;;  %s1269_s21 = smov [#allocation5]  }
   0xb   : > { %s1634_s18 = scalar_select %p1330_p4, 1, 0 }
   0xc   : > { %s1635_s19 = scalar_select %p1335_p6, 1, 0 }
   0xd   : > { %p1340_p8 = pnand %p888_p5, %p119_p7  ;;  %s131_s22 = sshll.u32 %s1269_s21, 4  ;;  %s132_s22 = int_to_ptr.vmem [resolvable:$true] %s131_s22 }
   0xe   : > { %s1270_s24 = smov [#allocation7]   ;;  %s1111_s28 = scalar_lea.hbm %s1628_s1, 16384 }
   0xf   : > { %s1636_s20 = scalar_select %p1340_p8, 1, 0 }
  0x10   : > { %p1049_p9 = pneg %p1340_p8  ;;  %s145_s25 = sshll.u32 %s1270_s24, 4  ;;  %s1352_s25 = int_to_ptr.vmem [resolvable:$true] %s145_s25 }
  0x11   : > { %p1112_p11 = scmp.ne.s32.totalorder %s1628_s1, %s1111_s28  ;;  %p1118_p3 = scmp.lt.u32.totalorder %s1111_s28, %s1628_s1 }
  0x12   : > { %p1348_p10 = pnand %p1049_p9, %p1631_p1 }
  0x14   : > { %p1113_p12 = pneg %p1348_p10 }
  0x16   : > { %p1114_p13 = pnand %p1113_p12, %p1112_p11 }
  0x18   : > { %p1115_p0 = pneg %p1114_p13 }
  0x1a   : > { %p1120_p5 = pnand %p1118_p3, %p1115_p0 }
  0x1c   : > { %1123 = shalt.err (!%p1120_p5)
}
  0x1d   : > { %s1124_s6 = scalar_lea.vmem %s132_s22, 16384  ;;  %p1132_p2 = scmp.lt.s32.totalorder %s132_s22, %s132_s22 }
  0x1e   : > { %p1125_p7 = scmp.ne.s32.totalorder %s132_s22, %s1124_s6  ;;  %p1133_p6 = scmp.lt.s32.totalorder %s1124_s6, %s1124_s6 }
  0x20   : > { %p1127_p9 = pnand %p1125_p7, %p1113_p12  ;;  %p1134_p4 = por %p1133_p6, %p1132_p2 }
  0x22   : > { %p1128_p1 = pneg %p1127_p9 }
  0x24   : > { %p1135_p8 = pnand %p1134_p4, %p1128_p1 }
  0x26   : > { %1138 = shalt.err (!%p1135_p8)
}
  0x27   : > { %s1271_s7 = smov 1024   ;;  %s1272_s8 = smov 64  }
  0x28   : > { %1052 = dma.hbm_to_vmem [thread:$0]  (!%p1348_p10), %s1628_s1, 16384, %s132_s22, [#allocation6], %s1271_s7, %s1271_s7, %s1272_s8  }
  0x29   : > { %s1139_s21 = scalar_lea.hbm %s1629_s2, 128 }
  0x2a   : > { %p1140_p11 = scmp.ne.s32.totalorder %s1629_s2, %s1139_s21  ;;  %p1146_p4 = scmp.lt.u32.totalorder %s1139_s21, %s1629_s2 }
  0x2c   : > { %p1142_p1 = pnand %p1140_p11, %p1113_p12 }
  0x2e   : > { %p1143_p2 = pneg %p1142_p1 }
  0x30   : > { %p1148_p6 = pnand %p1146_p4, %p1143_p2 }
  0x32   : > { %1151 = shalt.err (!%p1148_p6)
}
  0x33   : > { %s1152_s22 = scalar_lea.vmem %s1352_s25, 128  ;;  %p1160_p3 = scmp.lt.s32.totalorder %s1352_s25, %s1352_s25 }
  0x34   : > { %p1153_p8 = scmp.ne.s32.totalorder %s1352_s25, %s1152_s22  ;;  %p1161_p5 = scmp.lt.s32.totalorder %s1152_s22, %s1152_s22 }
  0x36   : > { %p1155_p13 = pnand %p1153_p8, %p1113_p12  ;;  %p1162_p7 = por %p1161_p5, %p1160_p3 }
  0x38   : > { %p1156_p0 = pneg %p1155_p13 }
  0x3a   : > { %p1163_p9 = pnand %p1162_p7, %p1156_p0 }
  0x3c   : > { %1166 = shalt.err (!%p1163_p9)
}
  0x3d   : > { %1055 = dma.hbm_to_vmem [thread:$0]  (!%p1348_p10), %s1629_s2, 128, %s1352_s25, [#allocation6]  }
  0x3e   : > { %s1402_s4 = sadd.s32 1, %s1267_s15   ;;  %s27_s23 = sadd.s32 1, %s1263_s14 }
  0x3f   : > { %s24_s5 = ssub.s32 %s1267_s15, %s1402_s4  ;;  %p34_p12 = scmp.ne.s32.totalorder %s1263_s14, %s1259_s13 }
  0x40   : > { %p25_p11 = scmp.eq.s32.totalorder %s24_s5, 0  ;;  %p35_p1 = scmp.eq.s32.totalorder %s1267_s15, 0 }
  0x41   : > { %p1638_p2 = scmp.eq.s32.totalorder %s1321_s16, 3  ;;  %p1066_p6 = scmp.lt.s32.totalorder %s1267_s15, 4 }
  0x42   : > { %s1418_s7 = scalar_select %p25_p11, %s1263_s14, %s27_s23  }
  0x43   : > { %p1412_p4 = por %p1638_p2, %p34_p12  ;;  %p36_p8 = por %p35_p1, %p34_p12 }
  0x44   : > { %s156_s8 = sand.u32 1, %s1263_s14   ;;  %s906_s25 = sshll.u32 %s1267_s15, 9 }
  0x45   : > { %s892_s9 = sshll.u32 %s156_s8, 5  ;;  %s1425_s17 = scalar_lea.hbm %s1627_s0, %s906_s25 }
  0x46   : > { %s160_s21 = scalar_lea.vmem [#allocation2], %s892_s9  ;;  %p1429_p10 = pnand %p1066_p6, %p36_p8 }
  0x47   : > { %s167_s24 = sshll.u32 %s160_s21, 4  ;;  %s1433_s27 = scalar_lea.sflag [#allocation3], %s156_s8  ;;  %s1427_s24 = int_to_ptr.vmem [resolvable:$true] %s167_s24 }
  0x48   : > { %s1167_s28 = scalar_lea.hbm %s1425_s17, 512  ;;  %p1169_p0 = pneg %p1429_p10 }
  0x49   : > { %p1168_p13 = scmp.ne.s32.totalorder %s1425_s17, %s1167_s28  ;;  %s1172_s30 = scalar_lea.hbm %s1627_s0, 2048 }
  0x4a   : > { %p1173_p7 = scmp.lt.u32.totalorder %s1425_s17, %s1627_s0  ;;  %p1174_p9 = scmp.lt.u32.totalorder %s1172_s30, %s1167_s28 }
  0x4b   : > { %p1170_p3 = pnand %p1169_p0, %p1168_p13  ;;  %p1176_p11 = scmp.lt.u32.totalorder %s1167_s28, %s1425_s17 }
  0x4c   : > { %p1175_p12 = por %p1174_p9, %p1173_p7 }
  0x4d   : > { %p1171_p5 = pneg %p1170_p3 }
  0x4e   : > { %p1177_p1 = por %p1176_p11, %p1175_p12 }
  0x50   : > { %p1178_p2 = pnand %p1177_p1, %p1171_p5 }
  0x52   : > { %1181 = shalt.err (!%p1178_p2)
}
  0x53   : > { %s1182_s8 = scalar_lea.vmem %s1427_s24, 512  ;;  %s1273_s9 = smov [#allocation2]  }
  0x54   : > { %p1183_p6 = scmp.ne.s32.totalorder %s1427_s24, %s1182_s8  ;;  %s1187_s25 = sshll.u32 %s1273_s9, 4  ;;  %s1188_s25 = int_to_ptr.vmem [resolvable:$false] %s1187_s25 }
  0x55   : > { %s1189_s10 = scalar_lea.vmem %s1188_s25, 1024  ;;  %p1190_p3 = scmp.lt.s32.totalorder %s1427_s24, %s1188_s25 }
  0x56   : > { %p1185_p8 = pnand %p1183_p6, %p1169_p0  ;;  %p1191_p7 = scmp.lt.s32.totalorder %s1189_s10, %s1182_s8 }
  0x58   : > { %p1186_p13 = pneg %p1185_p8  ;;  %p1192_p9 = por %p1191_p7, %p1190_p3 }
  0x5a   : > { %p1193_p12 = pnand %p1192_p9, %p1186_p13 }
  0x5c   : > { %1196 = shalt.err (!%p1193_p12)
}
  0x5d   : > { %s1274_s11 = smov 128   ;;  %s1275_s21 = smov 8  }
  0x5e   : > { %1059 = dma.hbm_to_vmem [thread:$0]  (!%p1429_p10), %s1425_s17, 512, %s1427_s24, %s1433_s27, %s1274_s11, %s1274_s11, %s1275_s21  }
  0x5f   : > { %p1641_p0 = scmp.ne.s32.totalorder %s1636_s20, 0 }
  0x60   : > { %s1464_s28 = sand.u32 (!%p1641_p0), 1, %s1259_s13   ;;  %p1642_p5 = scmp.ne.s32.totalorder (!%p1641_p0), %s1634_s18, 0 }
  0x61   : > { %179 = sbr.rel (%p1641_p0) target bundleno = 419 (0x1a3), region = 32  ;;  %s896_s22 = sshll.u32 (!%p1641_p0), %s1464_s28, 5 }
  0x62   : > { %s182_s29 = scalar_lea.sflag (!%p1641_p0), [#allocation3], %s1464_s28  ;;  %s1468_s30 = scalar_lea.vmem (!%p1641_p0), [#allocation2], %s896_s22 }
  0x68   : > { %1242 = dma.done.wait (%p1642_p5), %s182_s29, 512  }
  0x69   : > { %1244 = vsyncadd (%p1642_p5), %s182_s29, 4294966784  ;;  %p1643_p10 = scmp.eq.s32.totalorder %s1321_s16, 0 }
  0x6b   : > { %1246 = dma.done.wait (%p1643_p10), [#allocation6], 16512   ;;  %p1644_p11 = pmov %p1643_p10 }
  0x6c   : > { %v1276_v0 = vmov 0.0   ;;  %v223_v1 = vld [vmem:[#allocation5 + $0x8] sm:$0xff]  ;;  %v225_v3 = vld [vmem:[#allocation5 + $0x18] sm:$0xff]  ;;  %v222_v6 = vld [vmem:[#allocation5] sm:$0xff]  ;;  %s899_s18 = sshll.u32 %s1464_s28, 8  ;;  %s908_s17 = sshll.u32 %s1321_s16, 12 }
  0x6d   : > { %1248 = vsyncadd (%p1644_p11), [#allocation6], 4294950784  ;;  %456 = vmatprep.mubr.f32.mxu0 %v1276_v0  ;;  %545 = vmatprep.mubr.f32.mxu1 %v1276_v0  ;;  %v231_v2 = vld [vmem:[#allocation5 + $0x48] sm:$0xff]  ;;  %v233_v5 = vld [vmem:[#allocation5 + $0x58] sm:$0xff]  ;;  %s1535_s20 = scalar_lea.vmem [#allocation8], %s899_s18  ;;  %s1578_s16 = scalar_lea.hbm %s1630_s3, %s908_s17 }
  0x6e   : > { %v909_v4 = vpack.c.bf16 %v231_v2, %v223_v1  ;;  %v230_v7 = vld [vmem:[#allocation5 + $0x40] sm:$0xff]  ;;  %v941_v8 = vpack.c.bf16 %v233_v5, %v225_v3  ;;  %v224_v10 = vld [vmem:[#allocation5 + $0x10] sm:$0xff]  ;;  %v239_v12 = vld [vmem:[#allocation5 + $0x88] sm:$0xff]  ;;  %s795_s24 = sshll.u32 %s1535_s20, 4  ;;  %s781_s23 = scalar_lea.sflag [#allocation4], %s1464_s28  ;;  %s1580_s24 = int_to_ptr.vmem [resolvable:$true] %s795_s24 }
  0x6f   : > { %v911_v9 = vpack.c.bf16 %v230_v7, %v222_v6  ;;  %v232_v11 = vld [vmem:[#allocation5 + $0x50] sm:$0xff]  ;;  %v247_v14 = vld [vmem:[#allocation5 + $0xc8] sm:$0xff]  ;;  %v241_v15 = vld [vmem:[#allocation5 + $0x98] sm:$0xff]  ;;  %s1197_s5 = scalar_lea.vmem %s1580_s24, 4096  ;;  %s1277_s8 = smov [#allocation8]  }
  0x70   : > { %910 = vmatprep.subr.bf16.mxu0 %v909_v4  ;;  %v943_v13 = vpack.c.bf16 %v232_v11, %v224_v10  ;;  %v249_v16 = vld [vmem:[#allocation5 + $0xd8] sm:$0xff]  ;;  %942 = vmatprep.subr.bf16.mxu1 %v941_v8  ;;  %v913_v17 = vpack.c.bf16 %v247_v14, %v239_v12  ;;  %v238_v19 = vld [vmem:[#allocation5 + $0x80] sm:$0xff]  ;;  %v240_v21 = vld [vmem:[#allocation5 + $0x90] sm:$0xff]  ;;  %p1198_p1 = scmp.ne.s32.totalorder %s1580_s24, %s1197_s5  ;;  %s1201_s9 = sshll.u32 %s1277_s8, 4  ;;  %s1202_s9 = int_to_ptr.vmem [resolvable:$false] %s1201_s9 }
  0x71   : > { %912 = vmatpush1.bf16.msra.mxu0 %v911_v9  ;;  %v945_v18 = vpack.c.bf16 %v249_v16, %v241_v15  ;;  %v246_v20 = vld [vmem:[#allocation5 + $0xc0] sm:$0xff]  ;;  %v248_v23 = vld [vmem:[#allocation5 + $0xd0] sm:$0xff]  ;;  %v255_v24 = vld [vmem:[#allocation5 + $0x108] sm:$0xff]  ;;  %s1203_s25 = scalar_lea.vmem %s1202_s9, 8192  ;;  %p1204_p8 = scmp.lt.s32.totalorder %s1580_s24, %s1202_s9 }
  0x72   : > { %944 = vmatpush1.bf16.msra.mxu1 %v943_v13  ;;  %v915_v22 = vpack.c.bf16 %v246_v20, %v238_v19  ;;  %v263_v25 = vld [vmem:[#allocation5 + $0x148] sm:$0xff]  ;;  %914 = vmatprep.subr.bf16.mxu0 %v913_v17  ;;  %v947_v26 = vpack.c.bf16 %v248_v23, %v240_v21  ;;  %v257_v28 = vld [vmem:[#allocation5 + $0x118] sm:$0xff]  ;;  %v254_v30 = vld [vmem:[#allocation5 + $0x100] sm:$0xff]  ;;  %p1199_p2 = pnand %p1198_p1, %p1412_p4  ;;  %p1205_p13 = scmp.lt.s32.totalorder %s1203_s25, %s1197_s5 }
  0x73   : > { %946 = vmatprep.subr.bf16.mxu1 %v945_v18  ;;  %v917_v27 = vpack.c.bf16 %v263_v25, %v255_v24  ;;  %v265_v29 = vld [vmem:[#allocation5 + $0x158] sm:$0xff]  ;;  %v262_v32 = vld [vmem:[#allocation5 + $0x140] sm:$0xff]  ;;  %v256_v33 = vld [vmem:[#allocation5 + $0x110] sm:$0xff] }
  0x74   : > { %v949_v31 = vpack.c.bf16 %v265_v29, %v257_v28  ;;  %v264_v34 = vld [vmem:[#allocation5 + $0x150] sm:$0xff]  ;;  %v919_v35 = vpack.c.bf16 %v262_v32, %v254_v30  ;;  %v271_v36 = vld [vmem:[#allocation5 + $0x188] sm:$0xff]  ;;  %v273_v38 = vld [vmem:[#allocation5 + $0x198] sm:$0xff]  ;;  %p1200_p6 = pneg %p1199_p2  ;;  %p1206_p3 = por %p1205_p13, %p1204_p8 }
  0x75   : > { %916 = vmatpush1.bf16.msra.mxu0 %v915_v22  ;;  %v279_v37 = vld [vmem:[#allocation5 + $0x1c8] sm:$0xff]  ;;  %v951_v39 = vpack.c.bf16 %v264_v34, %v256_v33  ;;  %v281_v41 = vld [vmem:[#allocation5 + $0x1d8] sm:$0xff]  ;;  %v270_v42 = vld [vmem:[#allocation5 + $0x180] sm:$0xff] }
  0x76   : > { %948 = vmatpush1.bf16.msra.mxu1 %v947_v26  ;;  %918 = vmatprep.subr.bf16.mxu0 %v917_v27  ;;  %v921_v40 = vpack.c.bf16 %v279_v37, %v271_v36  ;;  %v278_v43 = vld [vmem:[#allocation5 + $0x1c0] sm:$0xff]  ;;  %v953_v44 = vpack.c.bf16 %v281_v41, %v273_v38  ;;  %v272_v45 = vld [vmem:[#allocation5 + $0x190] sm:$0xff]  ;;  %v287_v47 = vld [vmem:[#allocation5 + $0x208] sm:$0xff]  ;;  %p1207_p7 = pnand %p1206_p3, %p1200_p6 }
  0x77   : > { %950 = vmatprep.subr.bf16.mxu1 %v949_v31  ;;  %v280_v46 = vld [vmem:[#allocation5 + $0x1d0] sm:$0xff]  ;;  %v295_v48 = vld [vmem:[#allocation5 + $0x248] sm:$0xff]  ;;  %v289_v49 = vld [vmem:[#allocation5 + $0x218] sm:$0xff]  ;;  %v923_v51 = vpack.c.bf16 %v278_v43, %v270_v42 }
  0x78   : > { %v297_v50 = vld [vmem:[#allocation5 + $0x258] sm:$0xff]  ;;  %v955_v52 = vpack.c.bf16 %v280_v46, %v272_v45  ;;  %v925_v53 = vpack.c.bf16 %v295_v48, %v287_v47  ;;  %v286_v54 = vld [vmem:[#allocation5 + $0x200] sm:$0xff]  ;;  %v288_v56 = vld [vmem:[#allocation5 + $0x210] sm:$0xff] }
  0x79   : > { %920 = vmatpush1.bf16.msra.mxu0 %v919_v35  ;;  %v294_v55 = vld [vmem:[#allocation5 + $0x240] sm:$0xff]  ;;  %v957_v57 = vpack.c.bf16 %v297_v50, %v289_v49  ;;  %v296_v58 = vld [vmem:[#allocation5 + $0x250] sm:$0xff]  ;;  %v303_v59 = vld [vmem:[#allocation5 + $0x288] sm:$0xff] }
  0x7a   : > { %952 = vmatpush1.bf16.msra.mxu1 %v951_v39  ;;  %922 = vmatprep.subr.bf16.mxu0 %v921_v40  ;;  %v311_v60 = vld [vmem:[#allocation5 + $0x2c8] sm:$0xff]  ;;  %v305_v61 = vld [vmem:[#allocation5 + $0x298] sm:$0xff]  ;;  %v927_v63 = vpack.c.bf16 %v294_v55, %v286_v54  ;;  %v959_v1 = vpack.c.bf16 %v296_v58, %v288_v56  ;;  %v302_v3 = vld [vmem:[#allocation5 + $0x280] sm:$0xff] }
  0x7b   : > { %954 = vmatprep.subr.bf16.mxu1 %v953_v44  ;;  %v313_v62 = vld [vmem:[#allocation5 + $0x2d8] sm:$0xff]  ;;  %v929_v2 = vpack.c.bf16 %v311_v60, %v303_v59  ;;  %v310_v4 = vld [vmem:[#allocation5 + $0x2c0] sm:$0xff]  ;;  %v304_v5 = vld [vmem:[#allocation5 + $0x290] sm:$0xff] }
  0x7c   : > { %v961_v6 = vpack.c.bf16 %v313_v62, %v305_v61  ;;  %v312_v7 = vld [vmem:[#allocation5 + $0x2d0] sm:$0xff]  ;;  %v319_v8 = vld [vmem:[#allocation5 + $0x308] sm:$0xff]  ;;  %v321_v10 = vld [vmem:[#allocation5 + $0x318] sm:$0xff]  ;;  %v931_v12 = vpack.c.bf16 %v310_v4, %v302_v3 }
  0x7d   : > { %924 = vmatpush1.bf16.msra.mxu0 %v923_v51  ;;  %v327_v9 = vld [vmem:[#allocation5 + $0x348] sm:$0xff]  ;;  %v329_v11 = vld [vmem:[#allocation5 + $0x358] sm:$0xff]  ;;  %v963_v13 = vpack.c.bf16 %v312_v7, %v304_v5  ;;  %v318_v15 = vld [vmem:[#allocation5 + $0x300] sm:$0xff] }
  0x7e   : > { %956 = vmatpush1.bf16.msra.mxu1 %v955_v52  ;;  %926 = vmatprep.subr.bf16.mxu0 %v925_v53  ;;  %v933_v14 = vpack.c.bf16 %v327_v9, %v319_v8  ;;  %v326_v16 = vld [vmem:[#allocation5 + $0x340] sm:$0xff]  ;;  %v320_v17 = vld [vmem:[#allocation5 + $0x310] sm:$0xff]  ;;  %v965_v18 = vpack.c.bf16 %v329_v11, %v321_v10  ;;  %v335_v20 = vld [vmem:[#allocation5 + $0x388] sm:$0xff] }
  0x7f   : > { %958 = vmatprep.subr.bf16.mxu1 %v957_v57  ;;  %v328_v19 = vld [vmem:[#allocation5 + $0x350] sm:$0xff]  ;;  %v343_v21 = vld [vmem:[#allocation5 + $0x3c8] sm:$0xff]  ;;  %v337_v22 = vld [vmem:[#allocation5 + $0x398] sm:$0xff]  ;;  %v935_v24 = vpack.c.bf16 %v326_v16, %v318_v15 }
  0x80   : > { %v345_v23 = vld [vmem:[#allocation5 + $0x3d8] sm:$0xff]  ;;  %v967_v25 = vpack.c.bf16 %v328_v19, %v320_v17  ;;  %v937_v26 = vpack.c.bf16 %v343_v21, %v335_v20  ;;  %v334_v27 = vld [vmem:[#allocation5 + $0x380] sm:$0xff]  ;;  %v336_v29 = vld [vmem:[#allocation5 + $0x390] sm:$0xff] }
  0x81   : > { %928 = vmatpush1.bf16.msra.mxu0 %v927_v63  ;;  %v342_v28 = vld [vmem:[#allocation5 + $0x3c0] sm:$0xff]  ;;  %v969_v30 = vpack.c.bf16 %v345_v23, %v337_v22  ;;  %v344_v31 = vld [vmem:[#allocation5 + $0x3d0] sm:$0xff]  ;;  %v227_v32 = vld [vmem:[#allocation5 + $0x28] sm:$0xff] }
  0x82   : > { %960 = vmatpush1.bf16.msra.mxu1 %v959_v1  ;;  %930 = vmatprep.subr.bf16.mxu0 %v929_v2  ;;  %v235_v33 = vld [vmem:[#allocation5 + $0x68] sm:$0xff]  ;;  %v229_v34 = vld [vmem:[#allocation5 + $0x38] sm:$0xff]  ;;  %v939_v36 = vpack.c.bf16 %v342_v28, %v334_v27  ;;  %v971_v37 = vpack.c.bf16 %v344_v31, %v336_v29  ;;  %v226_v39 = vld [vmem:[#allocation5 + $0x20] sm:$0xff] }
  0x83   : > { %962 = vmatprep.subr.bf16.mxu1 %v961_v6  ;;  %v237_v35 = vld [vmem:[#allocation5 + $0x78] sm:$0xff]  ;;  %v973_v38 = vpack.c.bf16 %v235_v33, %v227_v32  ;;  %v234_v40 = vld [vmem:[#allocation5 + $0x60] sm:$0xff]  ;;  %v228_v41 = vld [vmem:[#allocation5 + $0x30] sm:$0xff] }
  0x84   : > { %v1005_v42 = vpack.c.bf16 %v237_v35, %v229_v34  ;;  %v236_v43 = vld [vmem:[#allocation5 + $0x70] sm:$0xff]  ;;  %v243_v44 = vld [vmem:[#allocation5 + $0xa8] sm:$0xff]  ;;  %v245_v46 = vld [vmem:[#allocation5 + $0xb8] sm:$0xff]  ;;  %v975_v49 = vpack.c.bf16 %v234_v40, %v226_v39 }
  0x85   : > { %932 = vmatpush1.bf16.msra.mxu0 %v931_v12  ;;  %v251_v45 = vld [vmem:[#allocation5 + $0xe8] sm:$0xff]  ;;  %v253_v47 = vld [vmem:[#allocation5 + $0xf8] sm:$0xff]  ;;  %v1481_v48 = vld [vmem:[%s1468_s30] sm:$0xff]  ;;  %v1007_v50 = vpack.c.bf16 %v236_v43, %v228_v41 }
  0x86   : > { %964 = vmatpush1.bf16.msra.mxu1 %v963_v13  ;;  %934 = vmatprep.subr.bf16.mxu0 %v933_v14  ;;  %v977_v51 = vpack.c.bf16 %v251_v45, %v243_v44  ;;  %v242_v52 = vld [vmem:[#allocation5 + $0xa0] sm:$0xff]  ;;  %v244_v54 = vld [vmem:[#allocation5 + $0xb0] sm:$0xff]  ;;  %v1009_v55 = vpack.c.bf16 %v253_v47, %v245_v46  ;;  %v259_v57 = vld [vmem:[#allocation5 + $0x128] sm:$0xff] }
  0x87   : > { %966 = vmatprep.subr.bf16.mxu1 %v965_v18  ;;  %v250_v53 = vld [vmem:[#allocation5 + $0xe0] sm:$0xff]  ;;  %v252_v56 = vld [vmem:[#allocation5 + $0xf0] sm:$0xff]  ;;  %v267_v58 = vld [vmem:[#allocation5 + $0x168] sm:$0xff] }
  0x88   : > { %v261_v59 = vld [vmem:[#allocation5 + $0x138] sm:$0xff]  ;;  %v979_v61 = vpack.c.bf16 %v250_v53, %v242_v52  ;;  %v1486_v62 = vld [vmem:[%s1468_s30 + $0x8] sm:$0xff]  ;;  %v1011_v63 = vpack.c.bf16 %v252_v56, %v244_v54  ;;  %v981_v1 = vpack.c.bf16 %v267_v58, %v259_v57  ;;  %v258_v2 = vld [vmem:[#allocation5 + $0x120] sm:$0xff] }
  0x89   : > { %936 = vmatpush1.bf16.msra.mxu0 %v935_v24  ;;  %v269_v60 = vld [vmem:[#allocation5 + $0x178] sm:$0xff]  ;;  %v266_v3 = vld [vmem:[#allocation5 + $0x160] sm:$0xff]  ;;  %v260_v4 = vld [vmem:[#allocation5 + $0x130] sm:$0xff] }
  0x8a   : > { %968 = vmatpush1.bf16.msra.mxu1 %v967_v25  ;;  %938 = vmatprep.subr.bf16.mxu0 %v937_v26  ;;  %v1013_v5 = vpack.c.bf16 %v269_v60, %v261_v59  ;;  %v268_v6 = vld [vmem:[#allocation5 + $0x170] sm:$0xff]  ;;  %v275_v7 = vld [vmem:[#allocation5 + $0x1a8] sm:$0xff]  ;;  %v277_v9 = vld [vmem:[#allocation5 + $0x1b8] sm:$0xff]  ;;  %v983_v11 = vpack.c.bf16 %v266_v3, %v258_v2 }
  0x8b   : > { %970 = vmatprep.subr.bf16.mxu1 %v969_v30  ;;  %v283_v8 = vld [vmem:[#allocation5 + $0x1e8] sm:$0xff]  ;;  %v285_v10 = vld [vmem:[#allocation5 + $0x1f8] sm:$0xff]  ;;  %v1493_v12 = vld [vmem:[%s1468_s30 + $0x10] sm:$0xff]  ;;  %v1015_v13 = vpack.c.bf16 %v268_v6, %v260_v4 }
  0x8c   : > { %v985_v14 = vpack.c.bf16 %v283_v8, %v275_v7  ;;  %v274_v15 = vld [vmem:[#allocation5 + $0x1a0] sm:$0xff]  ;;  %v276_v17 = vld [vmem:[#allocation5 + $0x1b0] sm:$0xff]  ;;  %v1017_v18 = vpack.c.bf16 %v285_v10, %v277_v9  ;;  %v291_v20 = vld [vmem:[#allocation5 + $0x228] sm:$0xff] }
  0x8d   : > { %940 = vmatpush1.bf16.msra.mxu0 %v939_v36  ;;  %v282_v16 = vld [vmem:[#allocation5 + $0x1e0] sm:$0xff]  ;;  %v284_v19 = vld [vmem:[#allocation5 + $0x1f0] sm:$0xff]  ;;  %v299_v21 = vld [vmem:[#allocation5 + $0x268] sm:$0xff] }
  0x8e   : > { %972 = vmatpush1.bf16.msra.mxu1 %v971_v37  ;;  %974 = vmatprep.subr.bf16.mxu0 %v973_v38  ;;  %v293_v22 = vld [vmem:[#allocation5 + $0x238] sm:$0xff]  ;;  %v987_v24 = vpack.c.bf16 %v282_v16, %v274_v15  ;;  %v1019_v26 = vpack.c.bf16 %v284_v19, %v276_v17  ;;  %v989_v27 = vpack.c.bf16 %v299_v21, %v291_v20  ;;  %v290_v28 = vld [vmem:[#allocation5 + $0x220] sm:$0xff]  ;;  %v292_v30 = vld [vmem:[#allocation5 + $0x230] sm:$0xff] }
  0x8f   : > { %1006 = vmatprep.subr.bf16.mxu1 %v1005_v42  ;;  %v301_v23 = vld [vmem:[#allocation5 + $0x278] sm:$0xff]  ;;  %v298_v29 = vld [vmem:[#allocation5 + $0x260] sm:$0xff]  ;;  %v300_v32 = vld [vmem:[#allocation5 + $0x270] sm:$0xff] }
  0x90   : > { %457 = vmatmul.mubr.f32.vlgmr.msra.gmra.mrb[0].mxu0 %v1481_v48  ;;  %v1500_v25 = vld [vmem:[%s1468_s30 + $0x18] sm:$0xff]  ;;  %v1021_v31 = vpack.c.bf16 %v301_v23, %v293_v22  ;;  %v307_v33 = vld [vmem:[#allocation5 + $0x2a8] sm:$0xff]  ;;  %v991_v37 = vpack.c.bf16 %v298_v29, %v290_v28  ;;  %v1023_v38 = vpack.c.bf16 %v300_v32, %v292_v30  ;;  %v306_v40 = vld [vmem:[#allocation5 + $0x2a0] sm:$0xff] }
  0x91   : > { %546 = vmatmul.mubr.f32.vlgmr.msra.gmra.mrb[0].mxu1 %v1481_v48  ;;  %976 = vmatpush1.bf16.msra.mxu0 %v975_v49  ;;  %v315_v34 = vld [vmem:[#allocation5 + $0x2e8] sm:$0xff]  ;;  %v309_v35 = vld [vmem:[#allocation5 + $0x2b8] sm:$0xff]  ;;  %v314_v41 = vld [vmem:[#allocation5 + $0x2e0] sm:$0xff] }
  0x92   : > { %1008 = vmatpush1.bf16.msra.mxu1 %v1007_v50  ;;  %978 = vmatprep.subr.bf16.mxu0 %v977_v51  ;;  %v317_v36 = vld [vmem:[#allocation5 + $0x2f8] sm:$0xff]  ;;  %v993_v39 = vpack.c.bf16 %v315_v34, %v307_v33  ;;  %v308_v42 = vld [vmem:[#allocation5 + $0x2b0] sm:$0xff]  ;;  %v323_v45 = vld [vmem:[#allocation5 + $0x328] sm:$0xff]  ;;  %v995_v50 = vpack.c.bf16 %v314_v41, %v306_v40 }
  0x93   : > { %1010 = vmatprep.subr.bf16.mxu1 %v1009_v55  ;;  %462 = vmatprep.mubr.f32.mxu0 %v1276_v0  ;;  %v1025_v43 = vpack.c.bf16 %v317_v36, %v309_v35  ;;  %v316_v44 = vld [vmem:[#allocation5 + $0x2f0] sm:$0xff]  ;;  %v331_v46 = vld [vmem:[#allocation5 + $0x368] sm:$0xff]  ;;  %v325_v47 = vld [vmem:[#allocation5 + $0x338] sm:$0xff] }
  0x94   : > { %551 = vmatprep.mubr.f32.mxu1 %v1276_v0  ;;  %463 = vmatmul.mubr.f32.gmra.mrb[2].mxu0 %v1486_v62  ;;  %v333_v49 = vld [vmem:[#allocation5 + $0x378] sm:$0xff]  ;;  %v1027_v51 = vpack.c.bf16 %v316_v44, %v308_v42  ;;  %v997_v52 = vpack.c.bf16 %v331_v46, %v323_v45  ;;  %v322_v53 = vld [vmem:[#allocation5 + $0x320] sm:$0xff]  ;;  %v324_v55 = vld [vmem:[#allocation5 + $0x330] sm:$0xff] }
  0x95   : > { %980 = vmatpush1.bf16.msra.mxu0 %v979_v61  ;;  %552 = vmatmul.mubr.f32.gmra.mrb[2].mxu1 %v1486_v62  ;;  %v330_v54 = vld [vmem:[#allocation5 + $0x360] sm:$0xff]  ;;  %v1029_v56 = vpack.c.bf16 %v333_v49, %v325_v47  ;;  %v332_v57 = vld [vmem:[#allocation5 + $0x370] sm:$0xff]  ;;  %v339_v58 = vld [vmem:[#allocation5 + $0x3a8] sm:$0xff] }
  0x96   : > { %1012 = vmatpush1.bf16.msra.mxu1 %v1011_v63  ;;  %982 = vmatprep.subr.bf16.mxu0 %v981_v1  ;;  %v347_v59 = vld [vmem:[#allocation5 + $0x3e8] sm:$0xff]  ;;  %v341_v60 = vld [vmem:[#allocation5 + $0x3b8] sm:$0xff]  ;;  %v999_v63 = vpack.c.bf16 %v330_v54, %v322_v53  ;;  %v1031_v1 = vpack.c.bf16 %v332_v57, %v324_v55  ;;  %v338_v3 = vld [vmem:[#allocation5 + $0x3a0] sm:$0xff] }
  0x97   : > { %1014 = vmatprep.subr.bf16.mxu1 %v1013_v5  ;;  %468 = vmatprep.mubr.f32.mxu0 %v1276_v0  ;;  %v349_v61 = vld [vmem:[#allocation5 + $0x3f8] sm:$0xff]  ;;  %v1001_v2 = vpack.c.bf16 %v347_v59, %v339_v58  ;;  %v346_v4 = vld [vmem:[#allocation5 + $0x3e0] sm:$0xff]  ;;  %v340_v6 = vld [vmem:[#allocation5 + $0x3b0] sm:$0xff] }
  0x98   : > { %557 = vmatprep.mubr.f32.mxu1 %v1276_v0  ;;  %469 = vmatmul.mubr.f32.gmra.mrb[4].mxu0 %v1493_v12  ;;  %v1033_v5 = vpack.c.bf16 %v349_v61, %v341_v60  ;;  %v348_v7 = vld [vmem:[#allocation5 + $0x3f0] sm:$0xff]  ;;  %v1003_v8 = vpack.c.bf16 %v346_v4, %v338_v3 }
  0x99   : > { %984 = vmatpush1.bf16.msra.mxu0 %v983_v11  ;;  %558 = vmatmul.mubr.f32.gmra.mrb[4].mxu1 %v1493_v12  ;;  %v1035_v9 = vpack.c.bf16 %v348_v7, %v340_v6  ;;  %v1525_v11 = vld [vmem:[#allocation7] sm:$0xff] }
  0x9a   : > { %1016 = vmatpush1.bf16.msra.mxu1 %v1015_v13  ;;  %986 = vmatprep.subr.bf16.mxu0 %v985_v14 }
  0x9b   : > { %1018 = vmatprep.subr.bf16.mxu1 %v1017_v18  ;;  %474 = vmatprep.mubr.f32.mxu0 %v1276_v0 }
  0x9c   : > { %563 = vmatprep.mubr.f32.mxu1 %v1276_v0  ;;  %475 = vmatmul.mubr.f32.gmra.mrb[6].mxu0 %v1500_v25 }
  0x9d   : > { %988 = vmatpush1.bf16.msra.mxu0 %v987_v24  ;;  %564 = vmatmul.mubr.f32.gmra.mrb[6].mxu1 %v1500_v25 }
  0x9e   : > { %1020 = vmatpush1.bf16.msra.mxu1 %v1019_v26  ;;  %990 = vmatprep.subr.bf16.mxu0 %v989_v27 }
  0x9f   : > { %1022 = vmatprep.subr.bf16.mxu1 %v1021_v31  ;;  %634 = vmatprep.mubr.f32.mxu0 %v1276_v0 }
  0xa0   : > { %723 = vmatprep.mubr.f32.mxu1 %v1276_v0 }
  0xa1   : > { %992 = vmatpush1.bf16.msra.mxu0 %v991_v37 }
  0xa2   : > { %1024 = vmatpush1.bf16.msra.mxu1 %v1023_v38  ;;  %994 = vmatprep.subr.bf16.mxu0 %v993_v39 }
  0xa3   : > { %1026 = vmatprep.subr.bf16.mxu1 %v1025_v43 }
  0xa5   : > { %996 = vmatpush1.bf16.msra.mxu0 %v995_v50 }
  0xa6   : > { %1028 = vmatpush1.bf16.msra.mxu1 %v1027_v51  ;;  %998 = vmatprep.subr.bf16.mxu0 %v997_v52 }
  0xa7   : > { %1030 = vmatprep.subr.bf16.mxu1 %v1029_v56 }
  0xa9   : > { %1000 = vmatpush1.bf16.msra.mxu0 %v999_v63 }
  0xaa   : > { %1032 = vmatpush1.bf16.msra.mxu1 %v1031_v1  ;;  %1002 = vmatprep.subr.bf16.mxu0 %v1001_v2 }
  0xab   : > { %1034 = vmatprep.subr.bf16.mxu1 %v1033_v5 }
  0xad   : > { %1004 = vmatpush1.bf16.msra.mxu0 %v1003_v8 }
  0xae   : > { %1036 = vmatpush1.bf16.msra.mxu1 %v1035_v9 }
  0xb0   : > { %635 = vmatmul.mubr.f32.vlgmr.msra.gmra.mrb[8].mxu0 %v1481_v48 }
  0xb1   : > { %724 = vmatmul.mubr.f32.vlgmr.msra.gmra.mrb[8].mxu1 %v1481_v48  ;;  %640 = vmatprep.mubr.f32.mxu0 %v1276_v0  ;;  %v352_v48 = vlaneseq }
  0xb2   : > { %729 = vmatprep.mubr.f32.mxu1 %v1276_v0 }
  0xb3   : > { %v1522_v10 = vshrl.u32 %v352_v48, 7 }
  0xb4   : > { %641 = vmatmul.mubr.f32.gmra.mrb[10].mxu0 %v1486_v62 }
  0xb5   : > { %730 = vmatmul.mubr.f32.gmra.mrb[10].mxu1 %v1486_v62  ;;  %646 = vmatprep.mubr.f32.mxu0 %v1276_v0  ;;  %v354_v62 = vsub.s32 0, %v1522_v10  ;;  %v362_v13 = vsub.s32 2, %v1522_v10  ;;  %v358_v14 = vsub.s32 1, %v1522_v10  ;;  %v370_v51 = vsub.s32 4, %v1522_v10 }
  0xb6   : > { %735 = vmatprep.mubr.f32.mxu1 %v1276_v0  ;;  %v378_v52 = vsub.s32 6, %v1522_v10  ;;  %v374_v53 = vsub.s32 5, %v1522_v10  ;;  %v382_v54 = vsub.s32 7, %v1522_v10 }
  0xb7   : > { %v363_v15 = vrot.slane %v1525_v11, %v362_v13  ;;  %v359_v16 = vrot.slane %v1525_v11, %v358_v14  ;;  %v371_v55 = vrot.slane %v1525_v11, %v370_v51 }
  0xb8   : > { %647 = vmatmul.mubr.f32.gmra.mrb[12].mxu0 %v1493_v12  ;;  %v379_v56 = vrot.slane %v1525_v11, %v378_v52  ;;  %v375_v57 = vrot.slane %v1525_v11, %v374_v53  ;;  %v383_v58 = vrot.slane %v1525_v11, %v382_v54 }
  0xb9   : > { %736 = vmatmul.mubr.f32.gmra.mrb[12].mxu1 %v1493_v12  ;;  %652 = vmatprep.mubr.f32.mxu0 %v1276_v0  ;;  %v366_v12 = vsub.s32 3, %v1522_v10 }
  0xba   : > { %741 = vmatprep.mubr.f32.mxu1 %v1276_v0  ;;  %v355_v0 = vrot.slane %v1525_v11, %v354_v62 }
  0xbb   : > { %v367_v17 = vrot.slane %v1525_v11, %v366_v12 }
  0xbc   : > { %653 = vmatmul.mubr.f32.gmra.mrb[14].mxu0 %v1500_v25 }
  0xbd   : > { %742 = vmatmul.mubr.f32.gmra.mrb[14].mxu1 %v1500_v25 }
 0x163   : > { %v458_v18 = vpop.f32.mrb[0].mxu0 }
 0x164   : > { %v459_v19 = vadd.f32 %v458_v18, %v355_v0  ;;  %v547_v20 = vpop.f32.mrb[0].mxu1  ;;  %v460_v21 = vpop.f32.mrb[1].mxu0 }
 0x165   : > { %v548_v22 = vadd.f32 %v547_v20, %v363_v15  ;;  %v461_v23 = vadd.f32 %v460_v21, %v359_v16  ;;  %v549_v24 = vpop.f32.mrb[1].mxu1 }
 0x166   : > { %748 = vst [vmem:[%s1535_s20] sm:$0xff] %v459_v19  ;;  %v550_v25 = vadd.f32 %v549_v24, %v367_v17 }
 0x167   : > { %750 = vst [vmem:[%s1535_s20 + $0x10] sm:$0xff] %v548_v22  ;;  %749 = vst [vmem:[%s1535_s20 + $0x8] sm:$0xff] %v461_v23  ;;  %v464_v26 = vpop.f32.mrb[2].mxu0 }
 0x168   : > { %751 = vst [vmem:[%s1535_s20 + $0x18] sm:$0xff] %v550_v25  ;;  %v465_v27 = vadd.f32 %v464_v26, %v355_v0  ;;  %v553_v28 = vpop.f32.mrb[2].mxu1  ;;  %v466_v29 = vpop.f32.mrb[3].mxu0 }
 0x169   : > { %v554_v30 = vadd.f32 %v553_v28, %v363_v15  ;;  %v467_v31 = vadd.f32 %v466_v29, %v359_v16  ;;  %v555_v32 = vpop.f32.mrb[3].mxu1 }
 0x16a   : > { %756 = vst [vmem:[%s1535_s20 + $0x40] sm:$0xff] %v465_v27  ;;  %v556_v33 = vadd.f32 %v555_v32, %v367_v17 }
 0x16b   : > { %758 = vst [vmem:[%s1535_s20 + $0x50] sm:$0xff] %v554_v30  ;;  %757 = vst [vmem:[%s1535_s20 + $0x48] sm:$0xff] %v467_v31  ;;  %v470_v34 = vpop.f32.mrb[4].mxu0 }
 0x16c   : > { %759 = vst [vmem:[%s1535_s20 + $0x58] sm:$0xff] %v556_v33  ;;  %v471_v35 = vadd.f32 %v470_v34, %v355_v0  ;;  %v559_v36 = vpop.f32.mrb[4].mxu1  ;;  %v472_v37 = vpop.f32.mrb[5].mxu0 }
 0x16d   : > { %v560_v38 = vadd.f32 %v559_v36, %v363_v15  ;;  %v473_v39 = vadd.f32 %v472_v37, %v359_v16  ;;  %v561_v40 = vpop.f32.mrb[5].mxu1 }
 0x16e   : > { %764 = vst [vmem:[%s1535_s20 + $0x80] sm:$0xff] %v471_v35  ;;  %v562_v41 = vadd.f32 %v561_v40, %v367_v17 }
 0x16f   : > { %766 = vst [vmem:[%s1535_s20 + $0x90] sm:$0xff] %v560_v38  ;;  %765 = vst [vmem:[%s1535_s20 + $0x88] sm:$0xff] %v473_v39  ;;  %v476_v42 = vpop.f32.mrb[6].mxu0 }
 0x170   : > { %767 = vst [vmem:[%s1535_s20 + $0x98] sm:$0xff] %v562_v41  ;;  %v477_v43 = vadd.f32 %v476_v42, %v355_v0  ;;  %v565_v44 = vpop.f32.mrb[6].mxu1  ;;  %v478_v45 = vpop.f32.mrb[7].mxu0 }
 0x171   : > { %v566_v46 = vadd.f32 %v565_v44, %v363_v15  ;;  %v479_v47 = vadd.f32 %v478_v45, %v359_v16  ;;  %v567_v49 = vpop.f32.mrb[7].mxu1 }
 0x172   : > { %772 = vst [vmem:[%s1535_s20 + $0xc0] sm:$0xff] %v477_v43  ;;  %v568_v50 = vadd.f32 %v567_v49, %v367_v17 }
 0x173   : > { %774 = vst [vmem:[%s1535_s20 + $0xd0] sm:$0xff] %v566_v46  ;;  %773 = vst [vmem:[%s1535_s20 + $0xc8] sm:$0xff] %v479_v47 }
 0x174   : > { %775 = vst [vmem:[%s1535_s20 + $0xd8] sm:$0xff] %v568_v50 }
 0x183   : > { %v636_v59 = vpop.f32.mrb[8].mxu0 }
 0x184   : > { %v637_v60 = vadd.f32 %v636_v59, %v371_v55  ;;  %v725_v61 = vpop.f32.mrb[8].mxu1  ;;  %v638_v63 = vpop.f32.mrb[9].mxu0 }
 0x185   : > { %v726_v1 = vadd.f32 %v725_v61, %v379_v56  ;;  %v639_v2 = vadd.f32 %v638_v63, %v375_v57  ;;  %v727_v3 = vpop.f32.mrb[9].mxu1 }
 0x186   : > { %752 = vst [vmem:[%s1535_s20 + $0x20] sm:$0xff] %v637_v60  ;;  %v728_v4 = vadd.f32 %v727_v3, %v383_v58 }
 0x187   : > { %754 = vst [vmem:[%s1535_s20 + $0x30] sm:$0xff] %v726_v1  ;;  %753 = vst [vmem:[%s1535_s20 + $0x28] sm:$0xff] %v639_v2  ;;  %v642_v5 = vpop.f32.mrb[10].mxu0 }
 0x188   : > { %755 = vst [vmem:[%s1535_s20 + $0x38] sm:$0xff] %v728_v4  ;;  %v643_v6 = vadd.f32 %v642_v5, %v371_v55  ;;  %v731_v7 = vpop.f32.mrb[10].mxu1  ;;  %v644_v8 = vpop.f32.mrb[11].mxu0 }
 0x189   : > { %v732_v9 = vadd.f32 %v731_v7, %v379_v56  ;;  %v645_v48 = vadd.f32 %v644_v8, %v375_v57  ;;  %v733_v10 = vpop.f32.mrb[11].mxu1 }
 0x18a   : > { %760 = vst [vmem:[%s1535_s20 + $0x60] sm:$0xff] %v643_v6  ;;  %v734_v62 = vadd.f32 %v733_v10, %v383_v58 }
 0x18b   : > { %762 = vst [vmem:[%s1535_s20 + $0x70] sm:$0xff] %v732_v9  ;;  %761 = vst [vmem:[%s1535_s20 + $0x68] sm:$0xff] %v645_v48  ;;  %v648_v11 = vpop.f32.mrb[12].mxu0 }
 0x18c   : > { %763 = vst [vmem:[%s1535_s20 + $0x78] sm:$0xff] %v734_v62  ;;  %v649_v13 = vadd.f32 %v648_v11, %v371_v55  ;;  %v737_v14 = vpop.f32.mrb[12].mxu1  ;;  %v650_v12 = vpop.f32.mrb[13].mxu0 }
 0x18d   : > { %v738_v0 = vadd.f32 %v737_v14, %v379_v56  ;;  %v651_v15 = vadd.f32 %v650_v12, %v375_v57  ;;  %v739_v16 = vpop.f32.mrb[13].mxu1 }
 0x18e   : > { %768 = vst [vmem:[%s1535_s20 + $0xa0] sm:$0xff] %v649_v13  ;;  %v740_v17 = vadd.f32 %v739_v16, %v383_v58 }
 0x18f   : > { %770 = vst [vmem:[%s1535_s20 + $0xb0] sm:$0xff] %v738_v0  ;;  %769 = vst [vmem:[%s1535_s20 + $0xa8] sm:$0xff] %v651_v15  ;;  %v654_v18 = vpop.f32.mrb[14].mxu0 }
 0x190   : > { %771 = vst [vmem:[%s1535_s20 + $0xb8] sm:$0xff] %v740_v17  ;;  %v655_v19 = vadd.f32 %v654_v18, %v371_v55  ;;  %v743_v20 = vpop.f32.mrb[14].mxu1  ;;  %v656_v21 = vpop.f32.mrb[15].mxu0 }
 0x191   : > { %v744_v22 = vadd.f32 %v743_v20, %v379_v56  ;;  %v657_v23 = vadd.f32 %v656_v21, %v375_v57  ;;  %v745_v24 = vpop.f32.mrb[15].mxu1 }
 0x192   : > { %776 = vst [vmem:[%s1535_s20 + $0xe0] sm:$0xff] %v655_v19  ;;  %v746_v25 = vadd.f32 %v745_v24, %v383_v58 }
 0x193   : > { %778 = vst [vmem:[%s1535_s20 + $0xf0] sm:$0xff] %v744_v22  ;;  %777 = vst [vmem:[%s1535_s20 + $0xe8] sm:$0xff] %v657_v23 }
 0x194   : > { %779 = vst [vmem:[%s1535_s20 + $0xf8] sm:$0xff] %v746_v25 }
 0x195   : > { %1210 = shalt.err (!%p1207_p7)
}
 0x196   : > { %s1211_s10 = scalar_lea.hbm %s1578_s16, 4096  ;;  %s1215_s22 = scalar_lea.hbm %s1630_s3, 16384 }
 0x197   : > { %p1212_p9 = scmp.ne.s32.totalorder %s1578_s16, %s1211_s10  ;;  %p1216_p5 = scmp.lt.u32.totalorder %s1578_s16, %s1630_s3 }
 0x198   : > { %p1217_p10 = scmp.lt.u32.totalorder %s1215_s22, %s1211_s10  ;;  %p1219_p1 = scmp.lt.u32.totalorder %s1211_s10, %s1578_s16 }
 0x199   : > { %p1213_p12 = pnand %p1212_p9, %p1412_p4 }
 0x19a   : > { %p1218_p11 = por %p1217_p10, %p1216_p5 }
 0x19b   : > { %p1214_p0 = pneg %p1213_p12 }
 0x19c   : > { %p1220_p2 = por %p1219_p1, %p1218_p11 }
 0x19e   : > { %p1221_p6 = pnand %p1220_p2, %p1214_p0 }
 0x1a0   : > { %1224 = shalt.err (!%p1221_p6)
}
 0x1a1   : > { %s1278_s18 = smov 1024   ;;  %s1279_s20 = smov 64  }
 0x1a2   : > { %1047 = dma.vmem_to_hbm [thread:$0]  (%p1412_p4), %s1580_s24, 4096, %s1578_s16, %s781_s23, %s1278_s18, %s1278_s18, %s1279_s20  }
 0x1a3 PF: > { %p1069_p8 = scmp.ge.s32.totalorder %s1267_s15, 2  ;;  %s810_s17 = sand.u32 1, %s1255_s12  }
 0x1a4   : > { %p1645_p13 = scmp.ne.s32.totalorder %s1635_s19, 0  ;;  %s811_s26 = scalar_lea.sflag [#allocation4], %s810_s17 }
 0x1a6   : > { %p1061_p3 = pnand %p1069_p8, %p1645_p13 }
 0x1a8   : > { %1250 = dma.done.wait (!%p1061_p3), %s811_s26, 4096  }
 0x1a9   : > { %1252 = vsyncadd (!%p1061_p3), %s811_s26, 4294963200  ;;  %p17_p7 = scmp.ge.s32.totalorder %s1402_s4, 6   ;;  %s1646_s12 = smov %s1259_s13 }
 0x1aa   : > { %s1647_s13 = smov %s1263_s14  ;;  %s1648_s14 = smov %s1418_s7 }
 0x1ab   : > { %s1649_s15 = smov %s1402_s4  ;;  %19 = sbr.rel (!%p17_p7) target bundleno = 6 (0x6), region = 85 }
 0x1b2   :  { %816 = vsyncpa [#allocation3], 1 }
 0x1b3   :  { %818 = vsyncpa [#allocation3 + $0x1], 1 }
 0x1b4   :  { %819 = vsyncpa [#allocation6], 1 }
 0x1b5   :  { %820 = vsyncpa [#allocation4], 1 }
 0x1b6   :  { %822 = vsyncpa [#allocation4 + $0x1], 1 }

</bundles_post_ra>
